<compile_context>
chip_gen: v6e
topology: v6e:2x2x1
jax: 0.10.0
libtpu: 0.0.40
codegen_flags: <defaults>
</compile_context>

<pallas_src>
import functools

import jax
import jax.numpy as jnp
from jax.experimental import pallas as pl
from jax.experimental.pallas import tpu as pltpu


def _round_up(x, m):
    return (x + m - 1) // m * m


def _patch_embed_kernel(x_ref, w_ref, b_ref, o_ref):
    # x_ref: (TM, Kp) bf16   w_ref: (Kp, Dp) bf16   b_ref: (1, Dp) f32
    # o_ref: (TM, Dp) out_dtype
    acc = jnp.dot(x_ref[...], w_ref[...], preferred_element_type=jnp.float32)
    o_ref[...] = (acc + b_ref[...]).astype(o_ref.dtype)


def patch_embed_forward(x, weight, bias, patch_size, *,
                        compute_dtype=jnp.bfloat16, out_dtype=None,
                        block_m=1024):
    """x: (B, C, H, W).  weight: (D, C, p, p).  bias: (D,).

    Returns (tokens, Wp): tokens (B, Hp*Wp, D), Wp = W // p — matching the
    PyTorch module's `return (x, W)` where W is the post-conv width.
    """
    if out_dtype is None:
        out_dtype = compute_dtype
    B, C, H, W = x.shape
    D = weight.shape[0]
    p = patch_size
    if H % p != 0 or W % p != 0:
        raise ValueError(f"H={H}, W={W} must be divisible by patch_size={p}")
    Hp, Wp = H // p, W // p
    Np = Hp * Wp
    N = B * Np
    K = C * p * p

    # ---- patch extraction: one XLA transpose/cast pass, done in bf16 so the
    # relayout moves half the bytes. Flatten each patch in (c, ph, pw) order
    # to match the OIHW weight flatten.
    patches = x.astype(compute_dtype).reshape(B, C, Hp, p, Wp, p)
    patches = patches.transpose(0, 2, 4, 1, 3, 5)            # (B, Hp, Wp, C, p, p)
    patches = patches.reshape(N, K)                           # (N, K)

    w_mat = weight.reshape(D, K).T.astype(compute_dtype)      # (K, D)
    b_mat = bias.reshape(1, D).astype(jnp.float32)            # (1, D)

    # ---- lane-dense contraction and output: pad K and D to multiples of 128.
    Kp = _round_up(K, 128)
    Dp = _round_up(D, 128)
    if Kp != K:
        patches = jnp.pad(patches, ((0, 0), (0, Kp - K)))
        w_mat = jnp.pad(w_mat, ((0, Kp - K), (0, 0)))
    if Dp != D:
        w_mat = jnp.pad(w_mat, ((0, 0), (0, Dp - D)))
        b_mat = jnp.pad(b_mat, ((0, 0), (0, Dp - D)))

    # ---- row tiling over N (pipelined, megacore-parallel axis).
    if N <= block_m:
        # Aim for >=2 grid steps (v7x has 2 TensorCores) and 256-aligned M.
        TM = min(block_m, _round_up(-(-N // 2), 256))
    else:
        TM = block_m
    Npad = _round_up(N, TM)
    if Npad != N:
        patches = jnp.pad(patches, ((0, Npad - N), (0, 0)))

    in_bytes = jnp.dtype(compute_dtype).itemsize
    out_bytes = jnp.dtype(out_dtype).itemsize
    cost = pl.CostEstimate(
        flops=2 * Npad * Kp * Dp,
        transcendentals=0,
        bytes_accessed=(Npad * Kp * in_bytes + Kp * Dp * in_bytes
                        + Npad * Dp * out_bytes),
    )

    out = pl.pallas_call(
        _patch_embed_kernel,
        out_shape=jax.ShapeDtypeStruct((Npad, Dp), out_dtype),
        grid=(Npad // TM,),
        in_specs=[
            pl.BlockSpec((TM, Kp), lambda i: (i, 0)),   # streamed row tiles
            pl.BlockSpec((Kp, Dp), lambda i: (0, 0)),   # resident weight
            pl.BlockSpec((1, Dp), lambda i: (0, 0)),    # resident bias
        ],
        out_specs=pl.BlockSpec((TM, Dp), lambda i: (i, 0)),
        compiler_params=pltpu.CompilerParams(
            dimension_semantics=("parallel",),
            vmem_limit_bytes=48 * 1024 * 1024,
        ),
        cost_estimate=cost,
    )(patches, w_mat, b_mat)

    if Npad != N or Dp != D:
        out = out[:N, :D]
    tokens = out.reshape(B, Np, D)
    return tokens, Wp


if __name__ == "__main__":
    # Small shapes consistent with the module: img_size=16, patch_size=4,
    # in_chans=4, embed_dim=32  ->  num_patches = (16/4)*(16/4) = 16.
    B, C, H, W = 2, 4, 16, 16
    p = 4
    D = 32

    key = jax.random.PRNGKey(0)
    kx, kw, kb = jax.random.split(key, 3)
    x = jax.random.normal(kx, (B, C, H, W), dtype=jnp.float32)
    weight = jax.random.normal(kw, (D, C, p, p), dtype=jnp.float32) * 0.02
    bias = jax.random.normal(kb, (D,), dtype=jnp.float32) * 0.02

    fwd = jax.jit(functools.partial(patch_embed_forward, patch_size=p))
    tokens, Wp_out = fwd(x, weight, bias)
    tokens = jax.block_until_ready(tokens)

    # Reference: plain-JAX strided conv (matches nn.Conv2d semantics).
    ref = jax.lax.conv_general_dilated(
        x, weight, window_strides=(p, p), padding="VALID",
        dimension_numbers=("NCHW", "OIHW", "NCHW"),
    ) + bias.reshape(1, D, 1, 1)
    ref = ref.reshape(B, D, -1).transpose(0, 2, 1)  # flatten(2).transpose(1,2)

    assert tokens.shape == (B, (H // p) * (W // p), D)
    assert tokens.dtype == jnp.bfloat16          # bf16 writeback by default
    assert int(Wp_out) == W // p
    # bf16 matmul inputs + bf16 output (f32 accumulation) -> relaxed tolerance.
    assert jnp.allclose(tokens.astype(jnp.float32), ref, atol=2e-2, rtol=2e-2)
    print("KERNEL_OK")
</pallas_src>

<mosaic_0001>
module attributes {stable_mosaic.version = 11 : i64} {
  func.func @_patch_embed_kernel(%arg0: i32, %arg1: memref<256x128xbf16, #tpu.memory_space<vmem>>, %arg2: memref<128x128xbf16, #tpu.memory_space<vmem>>, %arg3: memref<1x128xf32, #tpu.memory_space<vmem>>, %arg4: memref<256x128xbf16, #tpu.memory_space<vmem>>) attributes {dimension_semantics = [#tpu.dimension_semantics<parallel>], iteration_bounds = array<i64: 1>, scalar_prefetch = 0 : i64, scratch_operands = 0 : i64, tpu.core_type = #tpu.core_type<tc>, window_params = [{transform_indices = @transform_0, window_bounds = array<i64: 256, 128>}, {pipeline_mode = #tpu.pipeline_mode<synchronous>, transform_indices = @transform_1, window_bounds = array<i64: 128, 128>}, {pipeline_mode = #tpu.pipeline_mode<synchronous>, transform_indices = @transform_2, window_bounds = array<i64: 1, 128>}, {transform_indices = @transform_3, window_bounds = array<i64: 256, 128>}]} {
    %c0 = arith.constant 0 : index
    %c0_0 = arith.constant 0 : index
    %0 = vector.load %arg1[%c0, %c0_0] : memref<256x128xbf16, #tpu.memory_space<vmem>>, vector<256x128xbf16>
    %c0_1 = arith.constant 0 : index
    %c0_2 = arith.constant 0 : index
    %1 = vector.load %arg2[%c0_1, %c0_2] : memref<128x128xbf16, #tpu.memory_space<vmem>>, vector<128x128xbf16>
    %cst = arith.constant dense<0.000000e+00> : vector<256x128xf32>
    %2 = tpu.matmul %0, %1, %cst {dimension_numbers = #tpu.dot_dimension_numbers<[1], [0], [0], [1], [0, 0, 1, 1], [], []>} : vector<256x128xbf16>, vector<128x128xbf16>, vector<256x128xf32> -> vector<256x128xf32>
    %c0_3 = arith.constant 0 : index
    %c0_4 = arith.constant 0 : index
    %3 = vector.load %arg3[%c0_3, %c0_4] : memref<1x128xf32, #tpu.memory_space<vmem>>, vector<1x128xf32>
    %4 = vector.broadcast %3 : vector<1x128xf32> to vector<256x128xf32>
    %5 = arith.addf %2, %4 : vector<256x128xf32>
    %6 = arith.truncf %5 : vector<256x128xf32> to vector<256x128xbf16>
    %c0_5 = arith.constant 0 : index
    %c0_6 = arith.constant 0 : index
    %7 = vector.load %arg4[%c0_5, %c0_6] : memref<256x128xbf16, #tpu.memory_space<vmem>>, vector<256x128xbf16>
    tpu.vector_store %arg4[%c0_5, %c0_6], %6 {strides = array<i32>} : memref<256x128xbf16, #tpu.memory_space<vmem>>, vector<256x128xbf16>,
    return
  }
  func.func @transform_0(%arg0: i32) -> (i32, i32) {
    %c0_i32 = arith.constant 0 : i32
    %c0_i32_0 = arith.constant 0 : i32
    return %arg0, %c0_i32 : i32, i32
  }
  func.func @transform_1(%arg0: i32) -> (i32, i32) {
    %c0_i32 = arith.constant 0 : i32
    %c0_i32_0 = arith.constant 0 : i32
    %c0_i32_1 = arith.constant 0 : i32
    return %c0_i32, %c0_i32_0 : i32, i32
  }
  func.func @transform_2(%arg0: i32) -> (i32, i32) {
    %c0_i32 = arith.constant 0 : i32
    %c0_i32_0 = arith.constant 0 : i32
    %c0_i32_1 = arith.constant 0 : i32
    return %c0_i32, %c0_i32_0 : i32, i32
  }
  func.func @transform_3(%arg0: i32) -> (i32, i32) {
    %c0_i32 = arith.constant 0 : i32
    %c0_i32_0 = arith.constant 0 : i32
    return %arg0, %c0_i32 : i32, i32
  }
}

</mosaic_0001>

<bundles_post_ra>
// kernel: patch_embed_forward.1
= control target key start
LH: loop header
LB: loop body
LE: loop exit
PB: predicated region body
PF: predicated region fallthrough
CT: control target
= control target key end

     0   :  { %s1012_s1 = inlined_call_operand.vmem [shape: bf16[128,128], index: 1, kind: input, shape index: {}]   ;;  %s1013_s0 = inlined_call_operand.vmem [shape: bf16[256,128], index: 0, kind: input, shape index: {}]   ;;  %s1014_s2 = inlined_call_operand.vmem [shape: f32[1,128], index: 2, kind: input, shape index: {}]   ;;  %s1015_s3 = inlined_call_operand.vmem [shape: bf16[256,128], index: 3, kind: output, shape index: {}]  }
   0x1   :  { %v811_v0 = vld [vmem:[%s1012_s1 + $0x38] sm:$0xff]   ;;  %v812_v1 = vld [vmem:[%s1012_s1 + $0x30] sm:$0xff]   ;;  %v813_v2 = vld [vmem:[%s1012_s1 + $0x28] sm:$0xff]  }
   0x2   :  { %747 = vmatprep.subr.bf16.mxu0 %v811_v0  ;;  %795 = vmatprep.subr.bf16.mxu1 %v811_v0  ;;  %v814_v3 = vld [vmem:[%s1012_s1 + $0x20] sm:$0xff]   ;;  %v815_v6 = vld [vmem:[%s1012_s1 + $0x18] sm:$0xff]   ;;  %v816_v7 = vld [vmem:[%s1012_s1 + $0x10] sm:$0xff]  }
   0x3   :  { %748 = vmatpush3.bf16.msra.mxu0 %v811_v0  ;;  %803 = vmatpush3.bf16.msra.mxu1 %v811_v0  ;;  %v819_v4 = vld [vmem:[%s1013_s0] sm:$0xff]   ;;  %v817_v8 = vld [vmem:[%s1012_s1 + $0x8] sm:$0xff]   ;;  %v823_v12 = vld [vmem:[%s1013_s0 + $0x10] sm:$0xff]  }
   0x4   :  { %749 = vmatprep.subr.bf16.mxu0 %v812_v1  ;;  %796 = vmatprep.subr.bf16.mxu1 %v812_v1  ;;  %v820_v5 = vld [vmem:[%s1013_s0 + $0x40] sm:$0xff]   ;;  %v821_v10 = vld [vmem:[%s1013_s0 + $0x8] sm:$0xff]   ;;  %v824_v13 = vld [vmem:[%s1013_s0 + $0x50] sm:$0xff]  }
   0x5   :  { %763 = vmatprep.mubr.bf16.mxu0 %v819_v4  ;;  %779 = vmatprep.mubr.bf16.mxu1 %v820_v5  ;;  %v818_v9 = vld [vmem:[%s1012_s1] sm:$0xff]   ;;  %v822_v11 = vld [vmem:[%s1013_s0 + $0x48] sm:$0xff]   ;;  %v825_v14 = vld [vmem:[%s1013_s0 + $0x18] sm:$0xff]  }
   0x6   :  { %v826_v15 = vld [vmem:[%s1013_s0 + $0x58] sm:$0xff]   ;;  %v827_v16 = vld [vmem:[%s1013_s0 + $0x20] sm:$0xff]   ;;  %v829_v18 = vld [vmem:[%s1013_s0 + $0x28] sm:$0xff]  }
   0x7   :  { %750 = vmatpush3.bf16.msra.mxu0 %v812_v1  ;;  %804 = vmatpush3.bf16.msra.mxu1 %v812_v1  ;;  %v828_v17 = vld [vmem:[%s1013_s0 + $0x60] sm:$0xff]   ;;  %v830_v19 = vld [vmem:[%s1013_s0 + $0x68] sm:$0xff]   ;;  %v831_v20 = vld [vmem:[%s1013_s0 + $0x30] sm:$0xff]  }
   0x8   :  { %751 = vmatprep.subr.bf16.mxu0 %v813_v2  ;;  %797 = vmatprep.subr.bf16.mxu1 %v813_v2  ;;  %v832_v21 = vld [vmem:[%s1013_s0 + $0x70] sm:$0xff]   ;;  %v833_v22 = vld [vmem:[%s1013_s0 + $0x38] sm:$0xff]   ;;  %v930_v26 = vld [vmem:[%s1014_s2] ss:$0 sm:$0xff] }
   0x9   :  { %v834_v23 = vld [vmem:[%s1013_s0 + $0x78] sm:$0xff]  }
   0xb   :  { %752 = vmatpush3.bf16.msra.mxu0 %v813_v2  ;;  %805 = vmatpush3.bf16.msra.mxu1 %v813_v2 }
   0xc   :  { %753 = vmatprep.subr.bf16.mxu0 %v814_v3  ;;  %798 = vmatprep.subr.bf16.mxu1 %v814_v3 }
   0xf   :  { %754 = vmatpush3.bf16.msra.mxu0 %v814_v3  ;;  %806 = vmatpush3.bf16.msra.mxu1 %v814_v3 }
  0x10   :  { %755 = vmatprep.subr.bf16.mxu0 %v815_v6  ;;  %799 = vmatprep.subr.bf16.mxu1 %v815_v6 }
  0x13   :  { %756 = vmatpush3.bf16.msra.mxu0 %v815_v6  ;;  %807 = vmatpush3.bf16.msra.mxu1 %v815_v6 }
  0x14   :  { %757 = vmatprep.subr.bf16.mxu0 %v816_v7  ;;  %800 = vmatprep.subr.bf16.mxu1 %v816_v7 }
  0x17   :  { %758 = vmatpush3.bf16.msra.mxu0 %v816_v7  ;;  %808 = vmatpush3.bf16.msra.mxu1 %v816_v7 }
  0x18   :  { %759 = vmatprep.subr.bf16.mxu0 %v817_v8  ;;  %801 = vmatprep.subr.bf16.mxu1 %v817_v8 }
  0x1b   :  { %760 = vmatpush3.bf16.msra.mxu0 %v817_v8  ;;  %809 = vmatpush3.bf16.msra.mxu1 %v817_v8 }
  0x1c   :  { %761 = vmatprep.subr.bf16.mxu0 %v818_v9  ;;  %802 = vmatprep.subr.bf16.mxu1 %v818_v9 }
  0x1f   :  { %762 = vmatpush3.bf16.msra.mxu0 %v818_v9  ;;  %810 = vmatpush3.bf16.msra.mxu1 %v818_v9 }
  0x22   :  { %764 = vmatmul.mubr.bf16.vlgmr.msra.gmra.mxu0 %v821_v10  ;;  %780 = vmatmul.mubr.bf16.vlgmr.msra.gmra.mxu1 %v822_v11 }
  0x23   :  { %767 = vmatprep.mubr.bf16.mxu0 %v823_v12  ;;  %783 = vmatprep.mubr.bf16.mxu1 %v824_v13 }
  0x2a   :  { %768 = vmatmul.mubr.bf16.gmra.mxu0 %v825_v14  ;;  %784 = vmatmul.mubr.bf16.gmra.mxu1 %v826_v15 }
  0x2b   :  { %771 = vmatprep.mubr.bf16.mxu0 %v827_v16  ;;  %787 = vmatprep.mubr.bf16.mxu1 %v828_v17 }
  0x32   :  { %772 = vmatmul.mubr.bf16.gmra.mxu0 %v829_v18  ;;  %788 = vmatmul.mubr.bf16.gmra.mxu1 %v830_v19 }
  0x33   :  { %775 = vmatprep.mubr.bf16.mxu0 %v831_v20  ;;  %791 = vmatprep.mubr.bf16.mxu1 %v832_v21 }
  0x3a   :  { %776 = vmatmul.mubr.bf16.gmra.mxu0 %v833_v22  ;;  %792 = vmatmul.mubr.bf16.gmra.mxu1 %v834_v23 }
  0xe2   :  { %v765_v24 = vpop.f32.mrf.mxu0  ;;  %v781_v25 = vpop.f32.mrf.mxu1 }
  0xe3   :  { %v257_v31 = vadd.f32 %v765_v24, %v930_v26  ;;  %v321_v32 = vadd.f32 %v781_v25, %v930_v26 }
  0xe4   :  { %v248_v27 = vpop.f32.mrf.mxu0  ;;  %v312_v28 = vpop.f32.mrf.mxu1 }
  0xe5   :  { %v249_v35 = vadd.f32 %v930_v26, %v248_v27  ;;  %v313_v36 = vadd.f32 %v930_v26, %v312_v28 }
  0xe6   :  { %v766_v29 = vpop.f32.mrf.mxu0  ;;  %v782_v30 = vpop.f32.mrf.mxu1 }
  0xe7   :  { %v260_v33 = vadd.f32 %v766_v29, %v930_v26  ;;  %v324_v34 = vadd.f32 %v782_v30, %v930_v26 }
  0xe8   :  { %v251_v37 = vpop.f32.mrf.mxu0  ;;  %v315_v38 = vpop.f32.mrf.mxu1 }
  0xe9   :  { %v636_v39 = vpack.c.bf16 %v260_v33, %v257_v31  ;;  %v676_v40 = vpack.c.bf16 %v324_v34, %v321_v32  ;;  %v252_v41 = vadd.f32 %v930_v26, %v251_v37  ;;  %v316_v42 = vadd.f32 %v930_v26, %v315_v38 }
  0xea   :  { %v769_v43 = vpop.f32.mrf.mxu0  ;;  %v785_v44 = vpop.f32.mrf.mxu1 }
  0xeb   :  { %708 = vst [vmem:[%s1015_s3 + $0x8] sm:$0xff] %v636_v39   ;;  %716 = vst [vmem:[%s1015_s3 + $0x48] sm:$0xff] %v676_v40   ;;  %v631_v45 = vpack.c.bf16 %v252_v41, %v249_v35  ;;  %v671_v46 = vpack.c.bf16 %v316_v42, %v313_v36  ;;  %v273_v51 = vadd.f32 %v769_v43, %v930_v26 }
  0xec   :  { %v264_v47 = vpop.f32.mrf.mxu0  ;;  %v328_v48 = vpop.f32.mrf.mxu1  ;;  %v337_v52 = vadd.f32 %v785_v44, %v930_v26 }
  0xed   :  { %632 = vst [vmem:[%s1015_s3] sm:$0xff] %v631_v45   ;;  %715 = vst [vmem:[%s1015_s3 + $0x40] sm:$0xff] %v671_v46   ;;  %v265_v55 = vadd.f32 %v930_v26, %v264_v47  ;;  %v329_v56 = vadd.f32 %v930_v26, %v328_v48 }
  0xee   :  { %v770_v49 = vpop.f32.mrf.mxu0  ;;  %v786_v50 = vpop.f32.mrf.mxu1 }
  0xef   :  { %v276_v53 = vadd.f32 %v770_v49, %v930_v26  ;;  %v340_v54 = vadd.f32 %v786_v50, %v930_v26 }
  0xf0   :  { %v267_v57 = vpop.f32.mrf.mxu0  ;;  %v331_v58 = vpop.f32.mrf.mxu1 }
  0xf1   :  { %v646_v59 = vpack.c.bf16 %v276_v53, %v273_v51  ;;  %v686_v60 = vpack.c.bf16 %v340_v54, %v337_v52  ;;  %v268_v61 = vadd.f32 %v930_v26, %v267_v57  ;;  %v332_v62 = vadd.f32 %v930_v26, %v331_v58 }
  0xf2   :  { %v773_v63 = vpop.f32.mrf.mxu0  ;;  %v789_v0 = vpop.f32.mrf.mxu1 }
  0xf3   :  { %710 = vst [vmem:[%s1015_s3 + $0x18] sm:$0xff] %v646_v59   ;;  %718 = vst [vmem:[%s1015_s3 + $0x58] sm:$0xff] %v686_v60   ;;  %v641_v1 = vpack.c.bf16 %v268_v61, %v265_v55  ;;  %v681_v2 = vpack.c.bf16 %v332_v62, %v329_v56  ;;  %v289_v7 = vadd.f32 %v773_v63, %v930_v26 }
  0xf4   :  { %v280_v3 = vpop.f32.mrf.mxu0  ;;  %v344_v4 = vpop.f32.mrf.mxu1  ;;  %v353_v8 = vadd.f32 %v789_v0, %v930_v26 }
  0xf5   :  { %709 = vst [vmem:[%s1015_s3 + $0x10] sm:$0xff] %v641_v1   ;;  %717 = vst [vmem:[%s1015_s3 + $0x50] sm:$0xff] %v681_v2   ;;  %v281_v11 = vadd.f32 %v930_v26, %v280_v3  ;;  %v345_v12 = vadd.f32 %v930_v26, %v344_v4 }
  0xf6   :  { %v774_v5 = vpop.f32.mrf.mxu0  ;;  %v790_v6 = vpop.f32.mrf.mxu1 }
  0xf7   :  { %v292_v9 = vadd.f32 %v774_v5, %v930_v26  ;;  %v356_v10 = vadd.f32 %v790_v6, %v930_v26 }
  0xf8   :  { %v283_v13 = vpop.f32.mrf.mxu0  ;;  %v347_v14 = vpop.f32.mrf.mxu1 }
  0xf9   :  { %v656_v15 = vpack.c.bf16 %v292_v9, %v289_v7  ;;  %v696_v16 = vpack.c.bf16 %v356_v10, %v353_v8  ;;  %v284_v17 = vadd.f32 %v930_v26, %v283_v13  ;;  %v348_v18 = vadd.f32 %v930_v26, %v347_v14 }
  0xfa   :  { %v777_v19 = vpop.f32.mrf.mxu0  ;;  %v793_v20 = vpop.f32.mrf.mxu1 }
  0xfb   :  { %712 = vst [vmem:[%s1015_s3 + $0x28] sm:$0xff] %v656_v15   ;;  %720 = vst [vmem:[%s1015_s3 + $0x68] sm:$0xff] %v696_v16   ;;  %v651_v21 = vpack.c.bf16 %v284_v17, %v281_v11  ;;  %v691_v22 = vpack.c.bf16 %v348_v18, %v345_v12  ;;  %v305_v28 = vadd.f32 %v777_v19, %v930_v26 }
  0xfc   :  { %v296_v23 = vpop.f32.mrf.mxu0  ;;  %v360_v24 = vpop.f32.mrf.mxu1  ;;  %v369_v29 = vadd.f32 %v793_v20, %v930_v26 }
  0xfd   :  { %711 = vst [vmem:[%s1015_s3 + $0x20] sm:$0xff] %v651_v21   ;;  %719 = vst [vmem:[%s1015_s3 + $0x60] sm:$0xff] %v691_v22   ;;  %v297_v32 = vadd.f32 %v930_v26, %v296_v23  ;;  %v361_v33 = vadd.f32 %v930_v26, %v360_v24 }
  0xfe   :  { %v778_v25 = vpop.f32.mrf.mxu0  ;;  %v794_v27 = vpop.f32.mrf.mxu1 }
  0xff   :  { %v308_v30 = vadd.f32 %v778_v25, %v930_v26  ;;  %v372_v31 = vadd.f32 %v794_v27, %v930_v26 }
 0x100   :  { %v299_v34 = vpop.f32.mrf.mxu0  ;;  %v363_v35 = vpop.f32.mrf.mxu1 }
 0x101   :  { %v666_v36 = vpack.c.bf16 %v308_v30, %v305_v28  ;;  %v706_v37 = vpack.c.bf16 %v372_v31, %v369_v29  ;;  %v300_v38 = vadd.f32 %v930_v26, %v299_v34  ;;  %v364_v39 = vadd.f32 %v930_v26, %v363_v35 }
 0x103   :  { %714 = vst [vmem:[%s1015_s3 + $0x38] sm:$0xff] %v666_v36   ;;  %722 = vst [vmem:[%s1015_s3 + $0x78] sm:$0xff] %v706_v37   ;;  %v661_v40 = vpack.c.bf16 %v300_v38, %v297_v32  ;;  %v701_v41 = vpack.c.bf16 %v364_v39, %v361_v33 }
 0x105   :  { %713 = vst [vmem:[%s1015_s3 + $0x30] sm:$0xff] %v661_v40   ;;  %721 = vst [vmem:[%s1015_s3 + $0x70] sm:$0xff] %v701_v41  }

</bundles_post_ra>
